<compile_context>
chip_gen: v7x
topology: tpu7x:2x2x1
jax: 0.10.0
libtpu: 0.0.40
codegen_flags: <defaults>
</compile_context>

<pallas_src>
import functools

import jax
import jax.numpy as jnp
import numpy as np
from jax.experimental import pallas as pl
from jax.experimental.pallas import tpu as pltpu

_EPS = 1e-5


def _round_up(v, m):
    return ((v + m - 1) // m) * m


# ----------------------------------------------------------------------------
# Kernel
# ----------------------------------------------------------------------------
def _conv_net_kernel(poly_ref, inner_ref, mask_ref,
                     wc_ref, cb_ref,
                     bn0c_ref, bn0i_ref,
                     w1c_ref, w1i_ref, vec_ref,
                     w2_ref, w3_ref, w4_ref, b4_ref,
                     out_ref):
    # mask_ref holds 1/N for real batch rows and 0 for padded rows, so masked
    # sums ARE the batch means (training-mode BatchNorm, biased variance).
    maskn = mask_ref[...]                                   # (Np, 1)

    def bn(h, gamma, beta):
        # Fused one-pass batchnorm: one stats sweep, one FMA to apply.
        mu = jnp.sum(h * maskn, axis=0, keepdims=True)              # E[x]
        ex2 = jnp.sum(h * h * maskn, axis=0, keepdims=True)         # E[x^2]
        scale = gamma * jax.lax.rsqrt(ex2 - mu * mu + _EPS)
        return h * scale + (beta - mu * scale)

    # Conv + "shifted" conv (max-pool partner) in one MXU matmul.
    cc = jnp.dot(poly_ref[...], wc_ref[...],
                 preferred_element_type=jnp.float32) + cb_ref[...]  # (Np, 2*CWP)
    half = cc.shape[-1] // 2                                        # 128-aligned
    act = jnp.maximum(jnp.maximum(cc[:, :half], cc[:, half:]), 0.0)  # pool + ReLU

    bn0c = bn0c_ref[...]                                    # (2, CWP): gamma;beta
    bn0i = bn0i_ref[...]                                    # (2, 2P):  gamma;beta
    act = bn(act, bn0c[0:1, :], bn0c[1:2, :])               # BN0, conv features
    inner = bn(inner_ref[...], bn0i[0:1, :], bn0i[1:2, :])  # BN0, inner points

    vecs = vec_ref[...]                                     # (9, H) stacked vectors
    b1, g1, bt1 = vecs[0:1], vecs[1:2], vecs[2:3]
    b2, g2, bt2 = vecs[3:4], vecs[4:5], vecs[5:6]
    b3, g3, bt3 = vecs[6:7], vecs[7:8], vecs[8:9]

    h = jnp.tanh(jnp.dot(act, w1c_ref[...], preferred_element_type=jnp.float32)
                 + jnp.dot(inner, w1i_ref[...], preferred_element_type=jnp.float32)
                 + b1)
    h = bn(h, g1, bt1)
    h = jnp.tanh(jnp.dot(h, w2_ref[...], preferred_element_type=jnp.float32) + b2)
    h = bn(h, g2, bt2)
    h = jnp.tanh(jnp.dot(h, w3_ref[...], preferred_element_type=jnp.float32) + b3)
    h = bn(h, g3, bt3)

    # Lane-dense (Np, 128)-padded output slab; wrapper slices to out_dim.
    out_ref[...] = jnp.dot(h, w4_ref[...],
                           preferred_element_type=jnp.float32) + b4_ref[...]


# ----------------------------------------------------------------------------
# Wrapper-side layout plumbing (trace-time constants; fused under jit)
# ----------------------------------------------------------------------------
def _build_conv_operands(conv_w, conv_b, F, E, CWP):
    """Conv+pool as a matmul: wc (2(E+1), 2*CWP), cb (1, 2*CWP).

    Column k = 2E*f + j          -> conv value at (filter f, flat index j)
    Column CWP + k (j < 2(E-1))  -> conv value at (filter f, flat index j+2),
    i.e. the max-pool partner, so the pool is max(first half, second half).
    """
    PW = 2 * (E + 1)
    d = 2 * (E - 1)
    sel_a = np.zeros((F, PW, 2 * CWP), np.float32)   # multiplies conv_w[:, 0]
    sel_b = np.zeros((F, PW, 2 * CWP), np.float32)   # multiplies conv_w[:, 1]
    sel_c = np.zeros((F, 2 * CWP), np.float32)       # multiplies conv_b
    for f in range(F):
        for j in range(2 * E):
            k = 2 * E * f + j
            sel_a[f, j, k] = 1.0
            sel_b[f, j + 2, k] = 1.0
            sel_c[f, k] = 1.0
            if j < d:
                sel_a[f, j + 2, CWP + k] = 1.0
                sel_b[f, j + 4, CWP + k] = 1.0
                sel_c[f, CWP + k] = 1.0
    wc = (jnp.einsum('f,fjk->jk', conv_w[:, 0], jnp.asarray(sel_a))
          + jnp.einsum('f,fjk->jk', conv_w[:, 1], jnp.asarray(sel_b)))
    cb = jnp.einsum('f,fk->k', conv_b, jnp.asarray(sel_c))[None, :]
    return wc, cb


def _permute_bn0_w1(w1, g0, b0, F, E, CWP):
    """Pre-permute w1 rows / BN0 params to the kernel's conv layout.

    Kernel conv feature k = 2E*f + j (j < 2(E-1) valid) maps to PyTorch
    feature f*2(E-1) + j.  Junk/pad lanes get zero gamma/beta and zero w1 rows.
    """
    d = 2 * (E - 1)
    perm = np.zeros(CWP, np.int32)
    valid = np.zeros(CWP, np.float32)
    for f in range(F):
        for j in range(d):
            perm[2 * E * f + j] = f * d + j
            valid[2 * E * f + j] = 1.0
    permj = jnp.asarray(perm)
    validj = jnp.asarray(valid)
    w1c = jnp.take(w1[: F * d], permj, axis=0) * validj[:, None]   # (CWP, H)
    w1i = w1[F * d:]                                               # (2P, H)
    g0c = (jnp.take(g0[: F * d], permj, axis=0) * validj)[None, :]
    b0c = (jnp.take(b0[: F * d], permj, axis=0) * validj)[None, :]
    g0i = g0[F * d:][None, :]
    b0i = b0[F * d:][None, :]
    return w1c, w1i, g0c, b0c, g0i, b0i


@functools.partial(jax.jit, static_argnames=("nb_of_filters", "nb_of_edges",
                                             "nb_of_points", "out_dimension"))
def alt_2d_conv_net_forward(x, params, *, nb_of_filters, nb_of_edges,
                            nb_of_points, out_dimension):
    F, E, P = nb_of_filters, nb_of_edges, nb_of_points
    N = x.shape[0]
    HID = params["w1"].shape[1]
    PW = 2 * (E + 1)
    CWP = _round_up(2 * E * F, 128)          # lane-padded conv width
    OP = _round_up(out_dimension, 128)       # lane-dense output width
    Np = _round_up(max(N, 1), 8)             # sublane-aligned batch

    # Glue: drop channel dim (only channel 0 is read), flatten (H, W), split.
    x2d = x[:, 0, :, :].reshape(N, 2 * (E + 1 + P)).astype(jnp.float32)
    poly = x2d[:, :PW]
    inner = x2d[:, PW:]
    if Np != N:
        poly = jnp.pad(poly, ((0, Np - N), (0, 0)))
        inner = jnp.pad(inner, ((0, Np - N), (0, 0)))
    # 1/N for real rows, 0 for padded rows -> masked sums are batch means.
    maskn = ((jnp.arange(Np) < N).astype(jnp.float32) / float(N))[:, None]

    wc, cb = _build_conv_operands(params["conv_w"], params["conv_b"], F, E, CWP)
    w1c, w1i, g0c, b0c, g0i, b0i = _permute_bn0_w1(
        params["w1"], params["bn0_g"].reshape(-1), params["bn0_b"].reshape(-1),
        F, E, CWP)
    bn0c = jnp.concatenate([g0c, b0c], axis=0)               # (2, CWP)
    bn0i = jnp.concatenate([g0i, b0i], axis=0)               # (2, 2P)
    vecs = jnp.concatenate(
        [params["b1"], params["bn1_g"], params["bn1_b"],
         params["b2"], params["bn2_g"], params["bn2_b"],
         params["b3"], params["bn3_g"], params["bn3_b"]], axis=0)  # (9, H)
    w4p = jnp.pad(params["w4"], ((0, 0), (0, OP - out_dimension)))
    b4p = jnp.pad(params["b4"].reshape(1, -1), ((0, 0), (0, OP - out_dimension)))

    args = (poly, inner, maskn, wc, cb, bn0c, bn0i,
            w1c, w1i, vecs, params["w2"], params["w3"], w4p, b4p)

    flops = 2 * Np * (PW * 2 * CWP + CWP * HID + 2 * P * HID
                      + 2 * HID * HID + HID * OP)
    transcendentals = 3 * Np * HID
    bytes_accessed = 4 * (sum(int(np.prod(a.shape)) for a in args) + Np * OP)

    vmem = pl.BlockSpec(memory_space=pltpu.MemorySpace.VMEM)
    out = pl.pallas_call(
        _conv_net_kernel,
        out_shape=jax.ShapeDtypeStruct((Np, OP), jnp.float32),
        in_specs=[vmem] * len(args),
        out_specs=vmem,
        compiler_params=pltpu.CompilerParams(vmem_limit_bytes=32 * 1024 * 1024),
        cost_estimate=pl.CostEstimate(flops=flops,
                                      transcendentals=transcendentals,
                                      bytes_accessed=bytes_accessed),
    )(*args)
    return out[:N, :out_dimension]


# ----------------------------------------------------------------------------
# Params + pure-JAX reference (mirrors the PyTorch module, training-mode BN)
# ----------------------------------------------------------------------------
def init_params(key, nb_of_filters, nb_of_hidden_nodes, out_dimension,
                nb_of_edges, nb_of_points):
    F, H, O = nb_of_filters, nb_of_hidden_nodes, out_dimension
    E, P = nb_of_edges, nb_of_points
    D0 = 2 * F * (E - 1) + 2 * P
    ks = jax.random.split(key, 10)

    def lin(k, din, dout):
        return (jax.random.normal(k, (din, dout), jnp.float32)
                * (1.0 / np.sqrt(din))).astype(jnp.float32)

    return dict(
        # Conv2d weight (F, 1, 2, 1) stored squeezed as (F, 2); bias (F,)
        conv_w=(jax.random.normal(ks[0], (F, 2), jnp.float32) * 0.5),
        conv_b=(jax.random.normal(ks[1], (F,), jnp.float32) * 0.1),
        bn0_g=jnp.ones((1, D0), jnp.float32), bn0_b=jnp.zeros((1, D0), jnp.float32),
        w1=lin(ks[2], D0, H), b1=jax.random.normal(ks[3], (1, H), jnp.float32) * 0.1,
        bn1_g=jnp.ones((1, H), jnp.float32), bn1_b=jnp.zeros((1, H), jnp.float32),
        w2=lin(ks[4], H, H), b2=jax.random.normal(ks[5], (1, H), jnp.float32) * 0.1,
        bn2_g=jnp.ones((1, H), jnp.float32), bn2_b=jnp.zeros((1, H), jnp.float32),
        w3=lin(ks[6], H, H), b3=jax.random.normal(ks[7], (1, H), jnp.float32) * 0.1,
        bn3_g=jnp.ones((1, H), jnp.float32), bn3_b=jnp.zeros((1, H), jnp.float32),
        w4=lin(ks[8], H, O), b4=jax.random.normal(ks[9], (1, O), jnp.float32) * 0.1,
    )


def reference_forward(x, params, *, F, E, P):
    N = x.shape[0]
    poly = x[:, 0, :E + 1, :]                                   # (N, E+1, 2)
    inner = x[:, 0, E + 1:E + 1 + P, :].reshape(N, 2 * P)
    cw, cb = params["conv_w"], params["conv_b"]
    conv = (cw[None, :, 0, None, None] * poly[:, None, :E, :]
            + cw[None, :, 1, None, None] * poly[:, None, 1:, :]
            + cb[None, :, None, None])                          # (N, F, E, 2)
    pooled = jnp.maximum(conv[:, :, :E - 1, :], conv[:, :, 1:, :])
    act = jnp.maximum(pooled, 0.0).reshape(N, F * (E - 1) * 2)
    feat = jnp.concatenate([act, inner], axis=1)

    def bn(h, g, b):
        mu = h.mean(0, keepdims=True)
        var = ((h - mu) ** 2).mean(0, keepdims=True)
        return (h - mu) / jnp.sqrt(var + _EPS) * g + b

    h = bn(feat, params["bn0_g"], params["bn0_b"])
    h = jnp.tanh(h @ params["w1"] + params["b1"])
    h = bn(h, params["bn1_g"], params["bn1_b"])
    h = jnp.tanh(h @ params["w2"] + params["b2"])
    h = bn(h, params["bn2_g"], params["bn2_b"])
    h = jnp.tanh(h @ params["w3"] + params["b3"])
    h = bn(h, params["bn3_g"], params["bn3_b"])
    return h @ params["w4"] + params["b4"]


if __name__ == "__main__":
    NB_FILTERS = 4
    NB_HIDDEN = 32
    OUT_DIM = 4
    NB_EDGES = 8
    NB_POINTS = 8
    BATCH = 8

    key = jax.random.PRNGKey(0)
    kx, kp = jax.random.split(key)
    x = jax.random.normal(kx, (BATCH, 1, NB_EDGES + 1 + NB_POINTS, 2), jnp.float32)
    params = init_params(kp, NB_FILTERS, NB_HIDDEN, OUT_DIM, NB_EDGES, NB_POINTS)

    out = alt_2d_conv_net_forward(
        x, params,
        nb_of_filters=NB_FILTERS, nb_of_edges=NB_EDGES,
        nb_of_points=NB_POINTS, out_dimension=OUT_DIM)
    out = jax.block_until_ready(out)
    assert out.shape == (BATCH, OUT_DIM), out.shape

    ref = jax.block_until_ready(
        reference_forward(x, params, F=NB_FILTERS, E=NB_EDGES, P=NB_POINTS))
    np.testing.assert_allclose(np.asarray(out), np.asarray(ref),
                               atol=2e-2, rtol=2e-2)

    print("KERNEL_OK")
</pallas_src>

<mosaic_0001>
module attributes {stable_mosaic.version = 11 : i64} {
  func.func @_conv_net_kernel(%arg0: memref<8x18xf32, #tpu.memory_space<vmem>>, %arg1: memref<8x16xf32, #tpu.memory_space<vmem>>, %arg2: memref<8x1xf32, #tpu.memory_space<vmem>>, %arg3: memref<18x256xf32, #tpu.memory_space<vmem>>, %arg4: memref<1x256xf32, #tpu.memory_space<vmem>>, %arg5: memref<2x128xf32, #tpu.memory_space<vmem>>, %arg6: memref<2x16xf32, #tpu.memory_space<vmem>>, %arg7: memref<128x32xf32, #tpu.memory_space<vmem>>, %arg8: memref<16x32xf32, #tpu.memory_space<vmem>>, %arg9: memref<9x32xf32, #tpu.memory_space<vmem>>, %arg10: memref<32x32xf32, #tpu.memory_space<vmem>>, %arg11: memref<32x32xf32, #tpu.memory_space<vmem>>, %arg12: memref<32x128xf32, #tpu.memory_space<vmem>>, %arg13: memref<1x128xf32, #tpu.memory_space<vmem>>, %arg14: memref<8x128xf32, #tpu.memory_space<vmem>>) attributes {dimension_semantics = [], scalar_prefetch = 0 : i64, scratch_operands = 0 : i64, tpu.core_type = #tpu.core_type<tc>} {
    %c0 = arith.constant 0 : index
    %c0_0 = arith.constant 0 : index
    %0 = vector.load %arg2[%c0, %c0_0] : memref<8x1xf32, #tpu.memory_space<vmem>>, vector<8x1xf32>
    %c0_1 = arith.constant 0 : index
    %c0_2 = arith.constant 0 : index
    %1 = vector.load %arg0[%c0_1, %c0_2] : memref<8x18xf32, #tpu.memory_space<vmem>>, vector<8x18xf32>
    %c0_3 = arith.constant 0 : index
    %c0_4 = arith.constant 0 : index
    %2 = vector.load %arg3[%c0_3, %c0_4] : memref<18x256xf32, #tpu.memory_space<vmem>>, vector<18x256xf32>
    %cst = arith.constant dense<0.000000e+00> : vector<8x256xf32>
    %3 = tpu.matmul %1, %2, %cst {dimension_numbers = #tpu.dot_dimension_numbers<[1], [0], [0], [1], [0, 0, 1, 1], [], []>} : vector<8x18xf32>, vector<18x256xf32>, vector<8x256xf32> -> vector<8x256xf32>
    %c0_5 = arith.constant 0 : index
    %c0_6 = arith.constant 0 : index
    %4 = vector.load %arg4[%c0_5, %c0_6] : memref<1x256xf32, #tpu.memory_space<vmem>>, vector<1x256xf32>
    %5 = vector.broadcast %4 : vector<1x256xf32> to vector<8x256xf32>
    %6 = arith.addf %3, %5 : vector<8x256xf32>
    %7 = vector.extract_strided_slice %6 {offsets = [0, 0], sizes = [8, 128], strides = [1, 1]} : vector<8x256xf32> to vector<8x128xf32>
    %8 = vector.extract_strided_slice %6 {offsets = [0, 128], sizes = [8, 128], strides = [1, 1]} : vector<8x256xf32> to vector<8x128xf32>
    %9 = arith.maximumf %7, %8 : vector<8x128xf32>
    %cst_7 = arith.constant 0.000000e+00 : f32
    %10 = vector.broadcast %cst_7 : f32 to vector<8x128xf32>
    %11 = arith.maximumf %9, %10 : vector<8x128xf32>
    %c0_8 = arith.constant 0 : index
    %c0_9 = arith.constant 0 : index
    %12 = vector.load %arg5[%c0_8, %c0_9] : memref<2x128xf32, #tpu.memory_space<vmem>>, vector<2x128xf32>
    %c0_10 = arith.constant 0 : index
    %c0_11 = arith.constant 0 : index
    %13 = vector.load %arg6[%c0_10, %c0_11] : memref<2x16xf32, #tpu.memory_space<vmem>>, vector<2x16xf32>
    %14 = vector.extract_strided_slice %12 {offsets = [0, 0], sizes = [1, 128], strides = [1, 1]} : vector<2x128xf32> to vector<1x128xf32>
    %15 = vector.extract_strided_slice %12 {offsets = [1, 0], sizes = [1, 128], strides = [1, 1]} : vector<2x128xf32> to vector<1x128xf32>
    %16 = vector.broadcast %0 : vector<8x1xf32> to vector<8x128xf32>
    %17 = arith.mulf %11, %16 : vector<8x128xf32>
    %cst_12 = arith.constant dense<0.000000e+00> : vector<128xf32>
    %18 = vector.multi_reduction <add>, %17, %cst_12 [0] : vector<8x128xf32> to vector<128xf32>
    %19 = vector.shape_cast %18 : vector<128xf32> to vector<1x128xf32>
    %20 = arith.mulf %11, %11 : vector<8x128xf32>
    %21 = vector.broadcast %0 : vector<8x1xf32> to vector<8x128xf32>
    %22 = arith.mulf %20, %21 : vector<8x128xf32>
    %cst_13 = arith.constant dense<0.000000e+00> : vector<128xf32>
    %23 = vector.multi_reduction <add>, %22, %cst_13 [0] : vector<8x128xf32> to vector<128xf32>
    %24 = vector.shape_cast %23 : vector<128xf32> to vector<1x128xf32>
    %25 = arith.mulf %19, %19 : vector<1x128xf32>
    %26 = arith.subf %24, %25 : vector<1x128xf32>
    %cst_14 = arith.constant 9.99999974E-6 : f32
    %27 = vector.broadcast %cst_14 : f32 to vector<1x128xf32>
    %28 = arith.addf %26, %27 : vector<1x128xf32>
    %29 = math.rsqrt %28 : vector<1x128xf32>
    %30 = arith.mulf %14, %29 : vector<1x128xf32>
    %31 = vector.broadcast %30 : vector<1x128xf32> to vector<8x128xf32>
    %32 = arith.mulf %11, %31 : vector<8x128xf32>
    %33 = arith.mulf %19, %30 : vector<1x128xf32>
    %34 = arith.subf %15, %33 : vector<1x128xf32>
    %35 = vector.broadcast %34 : vector<1x128xf32> to vector<8x128xf32>
    %36 = arith.addf %32, %35 : vector<8x128xf32>
    %c0_15 = arith.constant 0 : index
    %c0_16 = arith.constant 0 : index
    %37 = vector.load %arg1[%c0_15, %c0_16] : memref<8x16xf32, #tpu.memory_space<vmem>>, vector<8x16xf32>
    %38 = vector.extract_strided_slice %13 {offsets = [0, 0], sizes = [1, 16], strides = [1, 1]} : vector<2x16xf32> to vector<1x16xf32>
    %39 = vector.extract_strided_slice %13 {offsets = [1, 0], sizes = [1, 16], strides = [1, 1]} : vector<2x16xf32> to vector<1x16xf32>
    %40 = vector.broadcast %0 : vector<8x1xf32> to vector<8x16xf32>
    %41 = arith.mulf %37, %40 : vector<8x16xf32>
    %cst_17 = arith.constant dense<0.000000e+00> : vector<16xf32>
    %42 = vector.multi_reduction <add>, %41, %cst_17 [0] : vector<8x16xf32> to vector<16xf32>
    %43 = vector.shape_cast %42 : vector<16xf32> to vector<1x16xf32>
    %44 = arith.mulf %37, %37 : vector<8x16xf32>
    %45 = vector.broadcast %0 : vector<8x1xf32> to vector<8x16xf32>
    %46 = arith.mulf %44, %45 : vector<8x16xf32>
    %cst_18 = arith.constant dense<0.000000e+00> : vector<16xf32>
    %47 = vector.multi_reduction <add>, %46, %cst_18 [0] : vector<8x16xf32> to vector<16xf32>
    %48 = vector.shape_cast %47 : vector<16xf32> to vector<1x16xf32>
    %49 = arith.mulf %43, %43 : vector<1x16xf32>
    %50 = arith.subf %48, %49 : vector<1x16xf32>
    %cst_19 = arith.constant 9.99999974E-6 : f32
    %51 = vector.broadcast %cst_19 : f32 to vector<1x16xf32>
    %52 = arith.addf %50, %51 : vector<1x16xf32>
    %53 = math.rsqrt %52 : vector<1x16xf32>
    %54 = arith.mulf %38, %53 : vector<1x16xf32>
    %55 = vector.broadcast %54 : vector<1x16xf32> to vector<8x16xf32>
    %56 = arith.mulf %37, %55 : vector<8x16xf32>
    %57 = arith.mulf %43, %54 : vector<1x16xf32>
    %58 = arith.subf %39, %57 : vector<1x16xf32>
    %59 = vector.broadcast %58 : vector<1x16xf32> to vector<8x16xf32>
    %60 = arith.addf %56, %59 : vector<8x16xf32>
    %c0_20 = arith.constant 0 : index
    %c0_21 = arith.constant 0 : index
    %61 = vector.load %arg9[%c0_20, %c0_21] : memref<9x32xf32, #tpu.memory_space<vmem>>, vector<9x32xf32>
    %62 = vector.extract_strided_slice %61 {offsets = [0, 0], sizes = [1, 32], strides = [1, 1]} : vector<9x32xf32> to vector<1x32xf32>
    %63 = vector.extract_strided_slice %61 {offsets = [1, 0], sizes = [1, 32], strides = [1, 1]} : vector<9x32xf32> to vector<1x32xf32>
    %64 = vector.extract_strided_slice %61 {offsets = [2, 0], sizes = [1, 32], strides = [1, 1]} : vector<9x32xf32> to vector<1x32xf32>
    %65 = vector.extract_strided_slice %61 {offsets = [3, 0], sizes = [1, 32], strides = [1, 1]} : vector<9x32xf32> to vector<1x32xf32>
    %66 = vector.extract_strided_slice %61 {offsets = [4, 0], sizes = [1, 32], strides = [1, 1]} : vector<9x32xf32> to vector<1x32xf32>
    %67 = vector.extract_strided_slice %61 {offsets = [5, 0], sizes = [1, 32], strides = [1, 1]} : vector<9x32xf32> to vector<1x32xf32>
    %68 = vector.extract_strided_slice %61 {offsets = [6, 0], sizes = [1, 32], strides = [1, 1]} : vector<9x32xf32> to vector<1x32xf32>
    %69 = vector.extract_strided_slice %61 {offsets = [7, 0], sizes = [1, 32], strides = [1, 1]} : vector<9x32xf32> to vector<1x32xf32>
    %70 = vector.extract_strided_slice %61 {offsets = [8, 0], sizes = [1, 32], strides = [1, 1]} : vector<9x32xf32> to vector<1x32xf32>
    %c0_22 = arith.constant 0 : index
    %c0_23 = arith.constant 0 : index
    %71 = vector.load %arg7[%c0_22, %c0_23] : memref<128x32xf32, #tpu.memory_space<vmem>>, vector<128x32xf32>
    %cst_24 = arith.constant dense<0.000000e+00> : vector<8x32xf32>
    %72 = tpu.matmul %36, %71, %cst_24 {dimension_numbers = #tpu.dot_dimension_numbers<[1], [0], [0], [1], [0, 0, 1, 1], [], []>} : vector<8x128xf32>, vector<128x32xf32>, vector<8x32xf32> -> vector<8x32xf32>
    %c0_25 = arith.constant 0 : index
    %c0_26 = arith.constant 0 : index
    %73 = vector.load %arg8[%c0_25, %c0_26] : memref<16x32xf32, #tpu.memory_space<vmem>>, vector<16x32xf32>
    %cst_27 = arith.constant dense<0.000000e+00> : vector<8x32xf32>
    %74 = tpu.matmul %60, %73, %cst_27 {dimension_numbers = #tpu.dot_dimension_numbers<[1], [0], [0], [1], [0, 0, 1, 1], [], []>} : vector<8x16xf32>, vector<16x32xf32>, vector<8x32xf32> -> vector<8x32xf32>
    %75 = arith.addf %72, %74 : vector<8x32xf32>
    %76 = vector.broadcast %62 : vector<1x32xf32> to vector<8x32xf32>
    %77 = arith.addf %75, %76 : vector<8x32xf32>
    %78 = math.tanh %77 : vector<8x32xf32>
    %79 = vector.broadcast %0 : vector<8x1xf32> to vector<8x32xf32>
    %80 = arith.mulf %78, %79 : vector<8x32xf32>
    %cst_28 = arith.constant dense<0.000000e+00> : vector<32xf32>
    %81 = vector.multi_reduction <add>, %80, %cst_28 [0] : vector<8x32xf32> to vector<32xf32>
    %82 = vector.shape_cast %81 : vector<32xf32> to vector<1x32xf32>
    %83 = arith.mulf %78, %78 : vector<8x32xf32>
    %84 = vector.broadcast %0 : vector<8x1xf32> to vector<8x32xf32>
    %85 = arith.mulf %83, %84 : vector<8x32xf32>
    %cst_29 = arith.constant dense<0.000000e+00> : vector<32xf32>
    %86 = vector.multi_reduction <add>, %85, %cst_29 [0] : vector<8x32xf32> to vector<32xf32>
    %87 = vector.shape_cast %86 : vector<32xf32> to vector<1x32xf32>
    %88 = arith.mulf %82, %82 : vector<1x32xf32>
    %89 = arith.subf %87, %88 : vector<1x32xf32>
    %cst_30 = arith.constant 9.99999974E-6 : f32
    %90 = vector.broadcast %cst_30 : f32 to vector<1x32xf32>
    %91 = arith.addf %89, %90 : vector<1x32xf32>
    %92 = math.rsqrt %91 : vector<1x32xf32>
    %93 = arith.mulf %63, %92 : vector<1x32xf32>
    %94 = vector.broadcast %93 : vector<1x32xf32> to vector<8x32xf32>
    %95 = arith.mulf %78, %94 : vector<8x32xf32>
    %96 = arith.mulf %82, %93 : vector<1x32xf32>
    %97 = arith.subf %64, %96 : vector<1x32xf32>
    %98 = vector.broadcast %97 : vector<1x32xf32> to vector<8x32xf32>
    %99 = arith.addf %95, %98 : vector<8x32xf32>
    %c0_31 = arith.constant 0 : index
    %c0_32 = arith.constant 0 : index
    %100 = vector.load %arg10[%c0_31, %c0_32] : memref<32x32xf32, #tpu.memory_space<vmem>>, vector<32x32xf32>
    %cst_33 = arith.constant dense<0.000000e+00> : vector<8x32xf32>
    %101 = tpu.matmul %99, %100, %cst_33 {dimension_numbers = #tpu.dot_dimension_numbers<[1], [0], [0], [1], [0, 0, 1, 1], [], []>} : vector<8x32xf32>, vector<32x32xf32>, vector<8x32xf32> -> vector<8x32xf32>
    %102 = vector.broadcast %65 : vector<1x32xf32> to vector<8x32xf32>
    %103 = arith.addf %101, %102 : vector<8x32xf32>
    %104 = math.tanh %103 : vector<8x32xf32>
    %105 = vector.broadcast %0 : vector<8x1xf32> to vector<8x32xf32>
    %106 = arith.mulf %104, %105 : vector<8x32xf32>
    %cst_34 = arith.constant dense<0.000000e+00> : vector<32xf32>
    %107 = vector.multi_reduction <add>, %106, %cst_34 [0] : vector<8x32xf32> to vector<32xf32>
    %108 = vector.shape_cast %107 : vector<32xf32> to vector<1x32xf32>
    %109 = arith.mulf %104, %104 : vector<8x32xf32>
    %110 = vector.broadcast %0 : vector<8x1xf32> to vector<8x32xf32>
    %111 = arith.mulf %109, %110 : vector<8x32xf32>
    %cst_35 = arith.constant dense<0.000000e+00> : vector<32xf32>
    %112 = vector.multi_reduction <add>, %111, %cst_35 [0] : vector<8x32xf32> to vector<32xf32>
    %113 = vector.shape_cast %112 : vector<32xf32> to vector<1x32xf32>
    %114 = arith.mulf %108, %108 : vector<1x32xf32>
    %115 = arith.subf %113, %114 : vector<1x32xf32>
    %cst_36 = arith.constant 9.99999974E-6 : f32
    %116 = vector.broadcast %cst_36 : f32 to vector<1x32xf32>
    %117 = arith.addf %115, %116 : vector<1x32xf32>
    %118 = math.rsqrt %117 : vector<1x32xf32>
    %119 = arith.mulf %66, %118 : vector<1x32xf32>
    %120 = vector.broadcast %119 : vector<1x32xf32> to vector<8x32xf32>
    %121 = arith.mulf %104, %120 : vector<8x32xf32>
    %122 = arith.mulf %108, %119 : vector<1x32xf32>
    %123 = arith.subf %67, %122 : vector<1x32xf32>
    %124 = vector.broadcast %123 : vector<1x32xf32> to vector<8x32xf32>
    %125 = arith.addf %121, %124 : vector<8x32xf32>
    %c0_37 = arith.constant 0 : index
    %c0_38 = arith.constant 0 : index
    %126 = vector.load %arg11[%c0_37, %c0_38] : memref<32x32xf32, #tpu.memory_space<vmem>>, vector<32x32xf32>
    %cst_39 = arith.constant dense<0.000000e+00> : vector<8x32xf32>
    %127 = tpu.matmul %125, %126, %cst_39 {dimension_numbers = #tpu.dot_dimension_numbers<[1], [0], [0], [1], [0, 0, 1, 1], [], []>} : vector<8x32xf32>, vector<32x32xf32>, vector<8x32xf32> -> vector<8x32xf32>
    %128 = vector.broadcast %68 : vector<1x32xf32> to vector<8x32xf32>
    %129 = arith.addf %127, %128 : vector<8x32xf32>
    %130 = math.tanh %129 : vector<8x32xf32>
    %131 = vector.broadcast %0 : vector<8x1xf32> to vector<8x32xf32>
    %132 = arith.mulf %130, %131 : vector<8x32xf32>
    %cst_40 = arith.constant dense<0.000000e+00> : vector<32xf32>
    %133 = vector.multi_reduction <add>, %132, %cst_40 [0] : vector<8x32xf32> to vector<32xf32>
    %134 = vector.shape_cast %133 : vector<32xf32> to vector<1x32xf32>
    %135 = arith.mulf %130, %130 : vector<8x32xf32>
    %136 = vector.broadcast %0 : vector<8x1xf32> to vector<8x32xf32>
    %137 = arith.mulf %135, %136 : vector<8x32xf32>
    %cst_41 = arith.constant dense<0.000000e+00> : vector<32xf32>
    %138 = vector.multi_reduction <add>, %137, %cst_41 [0] : vector<8x32xf32> to vector<32xf32>
    %139 = vector.shape_cast %138 : vector<32xf32> to vector<1x32xf32>
    %140 = arith.mulf %134, %134 : vector<1x32xf32>
    %141 = arith.subf %139, %140 : vector<1x32xf32>
    %cst_42 = arith.constant 9.99999974E-6 : f32
    %142 = vector.broadcast %cst_42 : f32 to vector<1x32xf32>
    %143 = arith.addf %141, %142 : vector<1x32xf32>
    %144 = math.rsqrt %143 : vector<1x32xf32>
    %145 = arith.mulf %69, %144 : vector<1x32xf32>
    %146 = vector.broadcast %145 : vector<1x32xf32> to vector<8x32xf32>
    %147 = arith.mulf %130, %146 : vector<8x32xf32>
    %148 = arith.mulf %134, %145 : vector<1x32xf32>
    %149 = arith.subf %70, %148 : vector<1x32xf32>
    %150 = vector.broadcast %149 : vector<1x32xf32> to vector<8x32xf32>
    %151 = arith.addf %147, %150 : vector<8x32xf32>
    %c0_43 = arith.constant 0 : index
    %c0_44 = arith.constant 0 : index
    %152 = vector.load %arg12[%c0_43, %c0_44] : memref<32x128xf32, #tpu.memory_space<vmem>>, vector<32x128xf32>
    %cst_45 = arith.constant dense<0.000000e+00> : vector<8x128xf32>
    %153 = tpu.matmul %151, %152, %cst_45 {dimension_numbers = #tpu.dot_dimension_numbers<[1], [0], [0], [1], [0, 0, 1, 1], [], []>} : vector<8x32xf32>, vector<32x128xf32>, vector<8x128xf32> -> vector<8x128xf32>
    %c0_46 = arith.constant 0 : index
    %c0_47 = arith.constant 0 : index
    %154 = vector.load %arg13[%c0_46, %c0_47] : memref<1x128xf32, #tpu.memory_space<vmem>>, vector<1x128xf32>
    %155 = vector.broadcast %154 : vector<1x128xf32> to vector<8x128xf32>
    %156 = arith.addf %153, %155 : vector<8x128xf32>
    %c0_48 = arith.constant 0 : index
    %c0_49 = arith.constant 0 : index
    %157 = vector.load %arg14[%c0_48, %c0_49] : memref<8x128xf32, #tpu.memory_space<vmem>>, vector<8x128xf32>
    tpu.vector_store %arg14[%c0_48, %c0_49], %156 {strides = array<i32>} : memref<8x128xf32, #tpu.memory_space<vmem>>, vector<8x128xf32>,
    return
  }
}

</mosaic_0001>

<bundles_post_ra>
// kernel: squeeze.3
= control target key start
LH: loop header
LB: loop body
LE: loop exit
PB: predicated region body
PF: predicated region fallthrough
CT: control target
= control target key end

     0   :  { %vm86_vm0 = vcmask 64512   ;;  %s344_s0 = inlined_call_operand.vmem [shape: f32[8,1,17,2], index: 0, kind: input, shape index: {}]   ;;  %s345_s1 = inlined_call_operand.vmem [shape: f32[8,34], index: 1, kind: output, shape index: {}]  }
   0x1   :  { %v183_v0 = vld [vmem:[%s344_s0 + $0x20] sm:$0x3]  ;;  %v184_v1 = vld [vmem:[%s344_s0 + $0x1e] sm:$0x3]  ;;  %v185_v2 = vld [vmem:[%s344_s0 + $0x1c] sm:$0x3] }
   0x2   :  { %8 = vst [vmem:[#allocation0 + $0x80] sm:$0x3] %v183_v0  ;;  %13 = vst [vmem:[#allocation0 + $0x78] sm:$0x3] %v184_v1  ;;  %v186_v3 = vld [vmem:[%s344_s0 + $0x1a] sm:$0x3] }
   0x3   :  { %18 = vst [vmem:[#allocation0 + $0x70] sm:$0x3] %v185_v2  ;;  %v187_v4 = vld [vmem:[%s344_s0 + $0x18] sm:$0x3]  ;;  %v188_v5 = vld [vmem:[%s344_s0 + $0x16] sm:$0x3] }
   0x4   :  { %23 = vst [vmem:[#allocation0 + $0x68] sm:$0x3] %v186_v3  ;;  %28 = vst [vmem:[#allocation0 + $0x60] sm:$0x3] %v187_v4  ;;  %v189_v6 = vld [vmem:[%s344_s0 + $0x14] sm:$0x3] }
   0x5   :  { %33 = vst [vmem:[#allocation0 + $0x58] sm:$0x3] %v188_v5  ;;  %v190_v7 = vld [vmem:[%s344_s0 + $0x12] sm:$0x3]  ;;  %v191_v8 = vld [vmem:[%s344_s0 + $0x10] sm:$0x3] }
   0x6   :  { %38 = vst [vmem:[#allocation0 + $0x50] sm:$0x3] %v189_v6  ;;  %43 = vst [vmem:[#allocation0 + $0x48] sm:$0x3] %v190_v7  ;;  %v192_v9 = vld [vmem:[%s344_s0 + $0xe] sm:$0x3] }
   0x7   :  { %48 = vst [vmem:[#allocation0 + $0x40] sm:$0x3] %v191_v8  ;;  %v193_v10 = vld [vmem:[%s344_s0 + $0xc] sm:$0x3]  ;;  %v194_v11 = vld [vmem:[%s344_s0 + $0xa] sm:$0x3] }
   0x8   :  { %53 = vst [vmem:[#allocation0 + $0x38] sm:$0x3] %v192_v9  ;;  %58 = vst [vmem:[#allocation0 + $0x30] sm:$0x3] %v193_v10  ;;  %v195_v12 = vld [vmem:[%s344_s0 + $0x8] sm:$0x3] }
   0x9   :  { %63 = vst [vmem:[#allocation0 + $0x28] sm:$0x3] %v194_v11  ;;  %v196_v13 = vld [vmem:[%s344_s0 + $0x6] sm:$0x3]  ;;  %v197_v14 = vld [vmem:[%s344_s0 + $0x4] sm:$0x3] }
   0xa   :  { %68 = vst [vmem:[#allocation0 + $0x20] sm:$0x3] %v195_v12  ;;  %73 = vst [vmem:[#allocation0 + $0x18] sm:$0x3] %v196_v13  ;;  %v198_v15 = vld [vmem:[%s344_s0 + $0x2] sm:$0x3] }
   0xb   :  { %78 = vst [vmem:[#allocation0 + $0x10] sm:$0x3] %v197_v14  ;;  %v83_v16 = vld [vmem:[%s344_s0] sm:$0x3]  ;;  %82 = vst [vmem:[#allocation0 + $0x8] sm:$0x3] %v198_v15 }
   0xc   :  { %84 = vst [vmem:[#allocation0] sm:$0x3] %v83_v16  ;;  %v154_v17 = vld [vmem:[#allocation0 + $0x70] sm:$0x3]   ;;  %v159_v18 = vld [vmem:[#allocation0 + $0x78] sm:$0x3]  }
   0xd   :  { %v164_v19 = vld [vmem:[#allocation0 + $0x80] sm:$0x3]   ;;  %v139_v20 = vld [vmem:[#allocation0 + $0x58] sm:$0x3]   ;;  %v149_v22 = vld [vmem:[#allocation0 + $0x68] sm:$0x3]  }
   0xe   :  { %v144_v21 = vld [vmem:[#allocation0 + $0x60] sm:$0x3]   ;;  %212 = vst.msk [vmem:[%s345_s1 + $0x1c] sm:$0x3] %vm86_vm0, %v154_v17   ;;  %213 = vst.msk [vmem:[%s345_s1 + $0x1e] sm:$0x3] %vm86_vm0, %v159_v18  }
   0xf   :  { %214 = vst.msk [vmem:[%s345_s1 + $0x20] sm:$0x3] %vm86_vm0, %v164_v19   ;;  %v124_v23 = vld [vmem:[#allocation0 + $0x40] sm:$0x3]   ;;  %v129_v24 = vld [vmem:[#allocation0 + $0x48] sm:$0x3]  }
  0x10   :  { %v134_v25 = vld [vmem:[#allocation0 + $0x50] sm:$0x3]   ;;  %209 = vst.msk [vmem:[%s345_s1 + $0x16] sm:$0x3] %vm86_vm0, %v139_v20   ;;  %210 = vst.msk [vmem:[%s345_s1 + $0x18] sm:$0x3] %vm86_vm0, %v144_v21  }
  0x11   :  { %211 = vst.msk [vmem:[%s345_s1 + $0x1a] sm:$0x3] %vm86_vm0, %v149_v22   ;;  %v109_v26 = vld [vmem:[#allocation0 + $0x28] sm:$0x3]   ;;  %v114_v27 = vld [vmem:[#allocation0 + $0x30] sm:$0x3]  }
  0x12   :  { %v119_v28 = vld [vmem:[#allocation0 + $0x38] sm:$0x3]   ;;  %206 = vst.msk [vmem:[%s345_s1 + $0x10] sm:$0x3] %vm86_vm0, %v124_v23   ;;  %207 = vst.msk [vmem:[%s345_s1 + $0x12] sm:$0x3] %vm86_vm0, %v129_v24  }
  0x13   :  { %208 = vst.msk [vmem:[%s345_s1 + $0x14] sm:$0x3] %vm86_vm0, %v134_v25   ;;  %v94_v29 = vld [vmem:[#allocation0 + $0x10] sm:$0x3]   ;;  %v99_v30 = vld [vmem:[#allocation0 + $0x18] sm:$0x3]  }
  0x14   :  { %v104_v31 = vld [vmem:[#allocation0 + $0x20] sm:$0x3]   ;;  %203 = vst.msk [vmem:[%s345_s1 + $0xa] sm:$0x3] %vm86_vm0, %v109_v26   ;;  %204 = vst.msk [vmem:[%s345_s1 + $0xc] sm:$0x3] %vm86_vm0, %v114_v27  }
  0x15   :  { %205 = vst.msk [vmem:[%s345_s1 + $0xe] sm:$0x3] %vm86_vm0, %v119_v28   ;;  %v85_v32 = vld [vmem:[#allocation0] sm:$0x3]   ;;  %v89_v33 = vld [vmem:[#allocation0 + $0x8] sm:$0x3]  }
  0x16   :  { %200 = vst.msk [vmem:[%s345_s1 + $0x4] sm:$0x3] %vm86_vm0, %v94_v29   ;;  %201 = vst.msk [vmem:[%s345_s1 + $0x6] sm:$0x3] %vm86_vm0, %v99_v30  }
  0x17   :  { %202 = vst.msk [vmem:[%s345_s1 + $0x8] sm:$0x3] %vm86_vm0, %v104_v31   ;;  %87 = vst.msk [vmem:[%s345_s1] sm:$0x3] %vm86_vm0, %v85_v32  }
  0x18   :  { %199 = vst.msk [vmem:[%s345_s1 + $0x2] sm:$0x3] %vm86_vm0, %v89_v33  }

// kernel: alt_2d_conv_net_forward.1
= control target key start
LH: loop header
LB: loop body
LE: loop exit
PB: predicated region body
PF: predicated region fallthrough
CT: control target
= control target key end

     0   :  { %v954_v3 = vmov 0.0   ;;  %v955_v4 = vmov 0   ;;  %vm71_vm0 = vcmask 1041408   ;;  %vm67_vm1 = vcmask 146432   ;;  %s1254_s3 = inlined_call_operand.vmem [shape: f32[18,256], index: 3, kind: input, shape index: {}]   ;;  %s1255_s2 = inlined_call_operand.vmem [shape: f32[8,1], index: 2, kind: input, shape index: {}]   ;;  %s1256_s0 = inlined_call_operand.vmem [shape: f32[8,18], index: 0, kind: input, shape index: {}]   ;;  %s1257_s7 = inlined_call_operand.vmem [shape: f32[128,32], index: 7, kind: input, shape index: {}]   ;;  %s1258_s8 = inlined_call_operand.vmem [shape: f32[16,32], index: 8, kind: input, shape index: {}]   ;;  %s1259_s1 = inlined_call_operand.vmem [shape: f32[8,16], index: 1, kind: input, shape index: {}]   ;;  %s1260_s6 = inlined_call_operand.vmem [shape: f32[2,16], index: 6, kind: input, shape index: {}]   ;;  %s1261_s4 = inlined_call_operand.vmem [shape: f32[1,256], index: 4, kind: input, shape index: {}]   ;;  %s1262_s5 = inlined_call_operand.vmem [shape: f32[2,128], index: 5, kind: input, shape index: {}]   ;;  %s1263_s10 = inlined_call_operand.vmem [shape: f32[32,32], index: 10, kind: input, shape index: {}]   ;;  %s1264_s9 = inlined_call_operand.vmem [shape: f32[9,32], index: 9, kind: input, shape index: {}]   ;;  %s1265_s11 = inlined_call_operand.vmem [shape: f32[32,32], index: 11, kind: input, shape index: {}]   ;;  %s1266_s12 = inlined_call_operand.vmem [shape: f32[32,128], index: 12, kind: input, shape index: {}]   ;;  %s1267_s13 = inlined_call_operand.vmem [shape: f32[1,128], index: 13, kind: input, shape index: {}]   ;;  %s1268_s14 = inlined_call_operand.vmem [shape: f32[8,128], index: 14, kind: output, shape index: {}]  }
   0x1   :  { %v50_v0 = vld [vmem:[%s1254_s3 + $0x8] sm:$0xff]  ;;  %v52_v1 = vld [vmem:[%s1254_s3 + $0x18] sm:$0xff]  ;;  %v49_v2 = vld [vmem:[%s1254_s3] sm:$0xff]  ;;  %142 = vmatprep.mubr.f32.mxu0 %v954_v3  ;;  %937 = vset.pattern.permute.xlu0 %v955_v4  ;;  %v956_v15 = vmov 0.0|0.0   ;;  %vm957_vm2 = vmmov 0   ;;  %vm195_vm3 = vcmask 130048   ;;  %v57_v62 = vlaneseq }
   0x2   :  { %v884_v5 = vpack.c.bf16 %v52_v1, %v50_v0  ;;  %v51_v6 = vld [vmem:[%s1254_s3 + $0x10] sm:$0xff]  ;;  %v54_v8 = vld [vmem:[%s1254_s3 + $0x28] sm:$0x3]  ;;  %v47_v9 = vld [vmem:[%s1255_s2] sm:$0xff]  ;;  %891 = vmatprep.subr.bf16.mxu1 %v956_v15  ;;  %848 = vmatprep.mubr.msk.f32.mxu1 %vm957_vm2, %v954_v3  ;;  %vm402_vm4 = vcmask 261120  }
   0x3   :  { %v886_v7 = vpack.c.bf16 %v51_v6, %v49_v2  ;;  %155 = vperm.xlu0 %937, %v47_v9   ;;  %v53_v10 = vld [vmem:[%s1254_s3 + $0x20] sm:$0x3]  ;;  %v235_v13 = vld [vmem:[%s1257_s7 + $0x8] sm:$0xff]  ;;  %v236_v19 = vld [vmem:[%s1257_s7 + $0x10] sm:$0xff]  ;;  %v1135_v63 = vshrl.u32 %v57_v62, 7 }
   0x4   :  { %885 = vmatprep.subr.bf16.mxu0 %v884_v5  ;;  %v48_v11 = vld [vmem:[%s1256_s0] sm:$0xff]  ;;  %v251_v17 = vld [vmem:[%s1258_s8 + $0x8] sm:$0xff]  ;;  %v237_v20 = vld [vmem:[%s1257_s7 + $0x18] sm:$0xff] }
   0x5   :  { %887 = vmatpush1.bf16.msra.mxu0 %v886_v7  ;;  %v234_v12 = vld [vmem:[%s1257_s7] sm:$0xff]  ;;  %v895_v21 = vpack.c.bf16 %v237_v20, %v236_v19  ;;  %v239_v23 = vld [vmem:[%s1257_s7 + $0x28] sm:$0xff]  ;;  %v240_v25 = vld [vmem:[%s1257_s7 + $0x30] sm:$0xff]  ;;  %v1141_v2 = vsub.s32 0, %v1135_v63 }
   0x6   :  { %766 = vmatprep.subr.msk.mxu0 %vm71_vm0, %v54_v8  ;;  %v892_v14 = vpack.c.bf16 %v235_v13, %v234_v12  ;;  %v250_v16 = vld [vmem:[%s1258_s8] sm:$0xff]  ;;  %v241_v26 = vld [vmem:[%s1257_s7 + $0x38] sm:$0xff]  ;;  %v243_v29 = vld [vmem:[%s1257_s7 + $0x48] sm:$0xff]  ;;  %v1145_v8 = vsub.s32 1, %v1135_v63 }
   0x7   :  { %v889_v18 = vpack.c.bf16 %v251_v17, %v250_v16  ;;  %v238_v22 = vld [vmem:[%s1257_s7 + $0x20] sm:$0xff]  ;;  %v901_v27 = vpack.c.bf16 %v241_v26, %v240_v25  ;;  %v244_v32 = vld [vmem:[%s1257_s7 + $0x50] sm:$0xff]  ;;  %v245_v33 = vld [vmem:[%s1257_s7 + $0x58] sm:$0xff] }
   0x8   :  { %893 = vmatpush3.bf16.msra.mxu1 %v892_v14  ;;  %v898_v24 = vpack.c.bf16 %v239_v23, %v238_v22  ;;  %v242_v28 = vld [vmem:[%s1257_s7 + $0x40] sm:$0xff]  ;;  %v907_v35 = vpack.c.bf16 %v245_v33, %v244_v32  ;;  %v247_v37 = vld [vmem:[%s1257_s7 + $0x68] sm:$0xff]  ;;  %v248_v44 = vld [vmem:[%s1257_s7 + $0x70] sm:$0xff] }
   0x9   :  { %767 = vmatpush1.msk.msra.mxu0 %vm71_vm0, %v53_v10  ;;  %894 = vmatprep.subr.bf16.mxu1 %v956_v15  ;;  %v193_v30 = vld [vmem:[%s1259_s1] sm:$0xff]  ;;  %v904_v31 = vpack.c.bf16 %v243_v29, %v242_v28  ;;  %v249_v45 = vld [vmem:[%s1257_s7 + $0x78] sm:$0xff] }
   0xa   :  { %768 = vmatmul.mubr.msk.f32.vlgmr.msra.gmra.mrb[0].mxu0 %vm67_vm1, %v48_v11  ;;  %888 = vmatprep.subr.bf16.mxu0 %v956_v15  ;;  %v203_v34 = vmul.f32 %v193_v30, %v193_v30  ;;  %v246_v36 = vld [vmem:[%s1257_s7 + $0x60] sm:$0xff]  ;;  %v913_v50 = vpack.c.bf16 %v249_v45, %v248_v44 }
   0xb   :  { %890 = vmatpush3.bf16.msra.mxu0 %v889_v18  ;;  %813 = vmatprep.mubr.msk.f32.mxu0 %vm957_vm2, %v954_v3  ;;  %v910_v41 = vpack.c.bf16 %v247_v37, %v246_v36  ;;  %v152_v0 = vld [vmem:[%s1260_s6] sm:$0x3] }
   0xc   :  { %896 = vmatpush3.bf16.msra.mxu1 %v895_v21  ;;  %915 = vmatprep.subr.bf16.mxu0 %v956_v15  ;;  %v55_v13 = vld [vmem:[%s1261_s4] sm:$0x3] }
   0xd   :  { %897 = vmatprep.subr.bf16.mxu1 %v956_v15  ;;  %v60_v14 = vrot.slane %v55_v13, %v1141_v2  ;;  %v64_v16 = vrot.slane %v55_v13, %v1145_v8 }
  0x10   :  { %899 = vmatpush3.bf16.msra.mxu1 %v898_v24 }
  0x11   :  { %900 = vmatprep.subr.bf16.mxu1 %v956_v15 }
  0x14   :  { %902 = vmatpush3.bf16.msra.mxu1 %v901_v27 }
  0x15   :  { %903 = vmatprep.subr.bf16.mxu1 %v956_v15 }
  0x18   :  { %905 = vmatpush3.bf16.msra.mxu1 %v904_v31 }
  0x19   :  { %906 = vmatprep.subr.bf16.mxu1 %v956_v15 }
  0x1c   :  { %908 = vmatpush3.bf16.msra.mxu1 %v907_v35 }
  0x1d   :  { %909 = vmatprep.subr.bf16.mxu1 %v956_v15 }
  0x20   :  { %911 = vmatpush3.bf16.msra.mxu1 %v910_v41 }
  0x21   :  { %912 = vmatprep.subr.bf16.mxu1 %v956_v15 }
  0x24   :  { %914 = vmatpush3.bf16.msra.mxu1 %v913_v50 }
  0x82   :  { %v1121_v38 = vpop.permute.xlu0 %155 }
  0x83   :  { %v194_v39 = vmul.f32 %v193_v30, %v1121_v38  ;;  %v204_v40 = vmul.f32 %v203_v34, %v1121_v38 }
  0x85   :  { %v196_v42 = vsel %vm195_vm3, %v194_v39, 0.0  ;;  %v205_v43 = vsel %vm195_vm3, %v204_v40, 0.0 }
  0x86   :  { %v197_v46 = vrot.slane %v196_v42, 4  ;;  %v206_v47 = vrot.slane %v205_v43, 4 }
  0x88   :  { %v198_v48 = vadd.f32 %v197_v46, %v196_v42  ;;  %v207_v49 = vadd.f32 %v206_v47, %v205_v43  ;;  %v151_v42 = vld [vmem:[%s1262_s5] sm:$0x3] }
  0x8a   :  { %v199_v51 = vrot.slane %v198_v48, 2  ;;  %v208_v52 = vrot.slane %v207_v49, 2 }
  0x8c   :  { %v200_v53 = vadd.f32 %v199_v51, %v198_v48  ;;  %v209_v54 = vadd.f32 %v208_v52, %v207_v49  ;;  %v439_v52 = vld [vmem:[%s1263_s10] sm:$0xff] }
  0x8e   :  { %v201_v55 = vrot.slane %v200_v53, 1  ;;  %v210_v56 = vrot.slane %v209_v54, 1 }
  0x90   :  { %v202_v57 = vadd.f32 %v201_v55, %v200_v53  ;;  %v211_v58 = vadd.f32 %v210_v56, %v209_v54  ;;  %v440_v53 = vld [vmem:[%s1263_s10 + $0x8] sm:$0xff]  ;;  %v441_v54 = vld [vmem:[%s1263_s10 + $0x10] sm:$0xff]  ;;  %v442_v56 = vld [vmem:[%s1263_s10 + $0x18] sm:$0xff] }
  0x91   :  { %v916_v55 = vpack.c.bf16 %v440_v53, %v439_v52 }
  0x92   :  { %v212_v59 = vmul.f32 %v202_v57, %v202_v57 }
  0x94   :  { %v213_v60 = vsub.f32 %v211_v58, %v212_v59 }
  0x96   :  { %v214_v61 = vadd.f32 1e-05, %v213_v60  ;;  %v1180_v60 = vld [vmem:[%s1264_s9] sm:$0xff] }
  0x98   :  { %938 = vrsqrt.f32 %v214_v61  ;;  %v398_v61 = vrot.slane %v1180_v60, %v1141_v2 }
  0xa2   :  { %v939_v1 = vpop.eup %938 }
  0xa3   :  { %v216_v4 = vmul.f32 %v939_v1, %v152_v0 }
  0xa5   :  { %v220_v5 = vrot.slane %v216_v4, %v1141_v2  ;;  %v222_v6 = vmul.f32 %v216_v4, %v202_v57  ;;  %v919_v57 = vpack.c.bf16 %v442_v56, %v441_v54 }
  0xa7   :  { %v224_v7 = vrot.slane %v222_v6, 7  ;;  %v221_v9 = vmul.f32 %v220_v5, %v193_v30 }
  0xa9   :  { %v226_v10 = vsub.f32 %v152_v0, %v224_v7 }
  0xab   :  { %v230_v11 = vrot.slane %v226_v10, %v1145_v8 }
  0xad   :  { %v231_v12 = vadd.f32 %v230_v11, %v221_v9 }
  0xaf   :  { %814 = vmatmul.mubr.msk.f32.vlgmr.msra.gmra.mrb[2].mxu0 %vm195_vm3, %v231_v12 }
  0xb0   :  { %859 = vmatprep.mubr.msk.f32.mxu0 %vm957_vm2, %v954_v3  ;;  %917 = vmatpush3.bf16.msra.mxu0 %v916_v55 }
  0xb1   :  { %918 = vmatprep.subr.bf16.mxu0 %v956_v15 }
  0xb4   :  { %920 = vmatpush3.bf16.msra.mxu0 %v919_v57 }
  0xb5   :  { %921 = vmatprep.subr.bf16.mxu0 %v956_v15 }
  0xdd   :  { %v144_v17 = vpop.f32.mrb[0].mxu0 }
  0xde   :  { %v145_v18 = vadd.f32 %v144_v17, %v60_v14  ;;  %v146_v19 = vpop.f32.mrb[1].mxu0 }
  0xdf   :  { %v147_v20 = vadd.f32 %v146_v19, %v64_v16 }
  0xe1   :  { %v149_v21 = vmax.f32 %v145_v18, %v147_v20 }
  0xe3   :  { %v150_v22 = vmax.f32 %v149_v21, 0.0 }
  0xe5   :  { %v158_v23 = vmul.f32 %v1121_v38, %v150_v22  ;;  %v165_v24 = vmul.f32 %v150_v22, %v150_v22 }
  0xe7   :  { %v159_v25 = vrot.slane %v158_v23, 4  ;;  %v166_v26 = vmul.f32 %v165_v24, %v1121_v38 }
  0xe9   :  { %v160_v27 = vadd.f32 %v159_v25, %v158_v23  ;;  %v167_v28 = vrot.slane %v166_v26, 4 }
  0xeb   :  { %v161_v29 = vrot.slane %v160_v27, 2  ;;  %v168_v30 = vadd.f32 %v167_v28, %v166_v26 }
  0xed   :  { %v162_v31 = vadd.f32 %v161_v29, %v160_v27  ;;  %v169_v32 = vrot.slane %v168_v30, 2 }
  0xef   :  { %v163_v33 = vrot.slane %v162_v31, 1  ;;  %v170_v34 = vadd.f32 %v169_v32, %v168_v30 }
  0xf1   :  { %v171_v35 = vrot.slane %v170_v34, 1  ;;  %v164_v36 = vadd.f32 %v163_v33, %v162_v31  ;;  %v436_v33 = vsub.s32 2, %v1135_v63 }
  0xf3   :  { %v172_v37 = vadd.f32 %v171_v35, %v170_v34  ;;  %v173_v39 = vmul.f32 %v164_v36, %v164_v36 }
  0xf5   :  { %v174_v40 = vsub.f32 %v172_v37, %v173_v39  ;;  %v558_v39 = vld [vmem:[%s1265_s11] sm:$0xff] }
  0xf7   :  { %v175_v41 = vadd.f32 1e-05, %v174_v40  ;;  %v560_v40 = vld [vmem:[%s1265_s11 + $0x10] sm:$0xff] }
  0xf9   :  { %940 = vrsqrt.f32 %v175_v41 }
 0x103   :  { %v941_v43 = vpop.eup %940 }
 0x104   :  { %v177_v44 = vmul.f32 %v941_v43, %v151_v42 }
 0x106   :  { %v183_v45 = vmul.f32 %v177_v44, %v164_v36  ;;  %v181_v46 = vrot.slane %v177_v44, %v1141_v2  ;;  %v445_v44 = vsub.s32 3, %v1135_v63 }
 0x108   :  { %v185_v47 = vrot.slane %v183_v45, 7  ;;  %v182_v49 = vmul.f32 %v181_v46, %v150_v22  ;;  %v446_v45 = vrot.slane %v1180_v60, %v445_v44 }
 0x10a   :  { %v187_v48 = vsub.f32 %v151_v42, %v185_v47  ;;  %v561_v42 = vld [vmem:[%s1265_s11 + $0x18] sm:$0xff] }
 0x10b   :  { %v925_v43 = vpack.c.bf16 %v561_v42, %v560_v40 }
 0x10c   :  { %v191_v50 = vrot.slane %v187_v48, %v1145_v8 }
 0x10e   :  { %v192_v51 = vadd.f32 %v191_v50, %v182_v49 }
 0x110   :  { %849 = vmatmul.mubr.f32.vlgmr.msra.gmra.mrb[0].mxu1 %v192_v51 }
 0x182   :  { %v321_v58 = vpop.f32.mrb[2].mxu0 }
 0x183   :  { %v815_v59 = vpop.f32.mrb[3].mxu0 }
 0x1e3   :  { %v391_v62 = vpop.f32.mrb[0].mxu1 }
 0x1e4   :  { %v392_v0 = vadd.f32 %v391_v62, %v321_v58  ;;  %v850_v1 = vpop.f32.mrb[1].mxu1 }
 0x1e6   :  { %v399_v4 = vadd.f32 %v398_v61, %v392_v0 }
 0x1e8   :  { %942 = vtanh.f32 %v399_v4 }
 0x1f2   :  { %v943_v5 = vpop.eup %942 }
 0x1f3   :  { %v410_v6 = vmul.f32 %v943_v5, %v943_v5  ;;  %v401_v7 = vmul.f32 %v943_v5, %v1121_v38 }
 0x1f5   :  { %v411_v9 = vmul.f32 %v410_v6, %v1121_v38  ;;  %v403_v10 = vsel %vm402_vm4, %v401_v7, 0.0 }
 0x1f6   :  { %v404_v11 = vrot.slane %v403_v10, 4 }
 0x1f7   :  { %v412_v12 = vsel %vm402_vm4, %v411_v9, 0.0 }
 0x1f8   :  { %v405_v13 = vadd.f32 %v404_v11, %v403_v10  ;;  %v413_v14 = vrot.slane %v412_v12, 4 }
 0x1fa   :  { %v406_v16 = vrot.slane %v405_v13, 2  ;;  %v414_v17 = vadd.f32 %v413_v14, %v412_v12 }
 0x1fc   :  { %v407_v18 = vadd.f32 %v406_v16, %v405_v13  ;;  %v415_v19 = vrot.slane %v414_v17, 2  ;;  %v545_v13 = vsub.s32 4, %v1135_v63 }
 0x1fe   :  { %v408_v20 = vrot.slane %v407_v18, 1  ;;  %v416_v21 = vadd.f32 %v415_v19, %v414_v17 }
 0x200   :  { %v409_v22 = vadd.f32 %v408_v20, %v407_v18  ;;  %v417_v23 = vrot.slane %v416_v21, 1  ;;  %v555_v18 = vsub.s32 5, %v1135_v63 }
 0x202   :  { %v418_v24 = vadd.f32 %v417_v23, %v416_v21  ;;  %v419_v25 = vmul.f32 %v409_v22, %v409_v22  ;;  %v677_v23 = vld [vmem:[%s1266_s12] sm:$0xff] }
 0x204   :  { %v420_v26 = vsub.f32 %v418_v24, %v419_v25  ;;  %v678_v24 = vld [vmem:[%s1266_s12 + $0x8] sm:$0xff]  ;;  %v679_v25 = vld [vmem:[%s1266_s12 + $0x10] sm:$0xff] }
 0x206   :  { %v421_v27 = vadd.f32 1e-05, %v420_v26  ;;  %v928_v26 = vpack.c.bf16 %v678_v24, %v677_v23 }
 0x208   :  { %944 = vrsqrt.f32 %v421_v27  ;;  %v680_v27 = vld [vmem:[%s1266_s12 + $0x18] sm:$0xff] }
 0x212   :  { %v945_v28 = vpop.eup %944 }
 0x213   :  { %v423_v29 = vmul.f32 %v945_v28, %v1180_v60  ;;  %v931_v28 = vpack.c.bf16 %v680_v27, %v679_v25 }
 0x215   :  { %v429_v30 = vmul.f32 %v423_v29, %v409_v22  ;;  %v427_v31 = vrot.slane %v423_v29, %v1145_v8  ;;  %v559_v8 = vld [vmem:[%s1265_s11 + $0x8] sm:$0xff] }
 0x216   :  { %v922_v41 = vpack.c.bf16 %v559_v8, %v558_v39 }
 0x217   :  { %v431_v32 = vrot.slane %v429_v30, 7  ;;  %v428_v35 = vmul.f32 %v943_v5, %v427_v31 }
 0x219   :  { %v433_v34 = vsub.f32 %v1180_v60, %v431_v32 }
 0x21b   :  { %v437_v36 = vrot.slane %v433_v34, %v436_v33 }
 0x21d   :  { %v438_v37 = vadd.f32 %v437_v36, %v428_v35 }
 0x21f   :  { %860 = vmatmul.mubr.msk.f32.vlgmr.msra.gmra.mrb[4].mxu0 %vm402_vm4, %v438_v37 }
 0x220   :  { %870 = vmatprep.mubr.msk.f32.mxu0 %vm957_vm2, %v954_v3  ;;  %923 = vmatpush3.bf16.msra.mxu0 %v922_v41 }
 0x221   :  { %924 = vmatprep.subr.bf16.mxu0 %v956_v15 }
 0x224   :  { %926 = vmatpush3.bf16.msra.mxu0 %v925_v43 }
 0x225   :  { %927 = vmatprep.subr.bf16.mxu0 %v956_v15 }
 0x2f2   :  { %v516_v46 = vpop.f32.mrb[4].mxu0 }
 0x2f3   :  { %v517_v47 = vadd.f32 %v516_v46, %v446_v45  ;;  %v861_v48 = vpop.f32.mrb[5].mxu0 }
 0x2f5   :  { %946 = vtanh.f32 %v517_v47 }
 0x2ff   :  { %v947_v49 = vpop.eup %946 }
 0x300   :  { %v521_v50 = vmul.f32 %v947_v49, %v1121_v38  ;;  %v529_v51 = vmul.f32 %v947_v49, %v947_v49 }
 0x302   :  { %v530_v52 = vmul.f32 %v529_v51, %v1121_v38  ;;  %v522_v53 = vsel %vm402_vm4, %v521_v50, 0.0 }
 0x303   :  { %v523_v54 = vrot.slane %v522_v53, 4 }
 0x304   :  { %v531_v55 = vsel %vm402_vm4, %v530_v52, 0.0 }
 0x305   :  { %v532_v56 = vrot.slane %v531_v55, 4  ;;  %v524_v57 = vadd.f32 %v523_v54, %v522_v53  ;;  %v664_v54 = vsub.s32 7, %v1135_v63 }
 0x307   :  { %v525_v58 = vrot.slane %v524_v57, 2  ;;  %v533_v59 = vadd.f32 %v532_v56, %v531_v55  ;;  %v233_v56 = vld [vmem:[%s1264_s9 + $0x8] sm:$0x1] }
 0x309   :  { %v526_v61 = vadd.f32 %v525_v58, %v524_v57  ;;  %v534_v62 = vrot.slane %v533_v59, 2 }
 0x30b   :  { %v527_v0 = vrot.slane %v526_v61, 1  ;;  %v535_v1 = vadd.f32 %v534_v62, %v533_v59 }
 0x30d   :  { %v528_v4 = vadd.f32 %v527_v0, %v526_v61  ;;  %v536_v5 = vrot.slane %v535_v1, 1 }
 0x30f   :  { %v537_v6 = vadd.f32 %v536_v5, %v535_v1  ;;  %v538_v7 = vmul.f32 %v528_v4, %v528_v4 }
 0x311   :  { %v539_v9 = vsub.f32 %v537_v6, %v538_v7 }
 0x313   :  { %v540_v10 = vadd.f32 1e-05, %v539_v9 }
 0x315   :  { %948 = vrsqrt.f32 %v540_v10 }
 0x31f   :  { %v949_v11 = vpop.eup %948 }
 0x320   :  { %v542_v12 = vmul.f32 %v949_v11, %v1180_v60 }
 0x322   :  { %v548_v14 = vmul.f32 %v542_v12, %v528_v4  ;;  %v546_v16 = vrot.slane %v542_v12, %v545_v13 }
 0x324   :  { %v550_v17 = vrot.slane %v548_v14, 7  ;;  %v547_v20 = vmul.f32 %v947_v49, %v546_v16 }
 0x326   :  { %v552_v19 = vsub.f32 %v1180_v60, %v550_v17 }
 0x328   :  { %v556_v21 = vrot.slane %v552_v19, %v555_v18 }
 0x32a   :  { %v557_v22 = vadd.f32 %v556_v21, %v547_v20 }
 0x32c   :  { %871 = vmatmul.mubr.msk.f32.vlgmr.msra.gmra.mrb[6].mxu0 %vm402_vm4, %v557_v22 }
 0x32d   :  { %881 = vmatprep.mubr.msk.f32.mxu0 %vm957_vm2, %v954_v3  ;;  %929 = vmatpush3.bf16.msra.mxu0 %v928_v26  ;;  %v564_v3 = vsub.s32 6, %v1135_v63 }
 0x32e   :  { %930 = vmatprep.subr.bf16.mxu0 %v956_v15 }
 0x32f   :  { %v565_v29 = vrot.slane %v1180_v60, %v564_v3 }
 0x331   :  { %932 = vmatpush3.bf16.msra.mxu0 %v931_v28 }
 0x3ff   :  { %v635_v30 = vpop.f32.mrb[6].mxu0 }
 0x400   :  { %v636_v31 = vadd.f32 %v635_v30, %v565_v29  ;;  %v872_v32 = vpop.f32.mrb[7].mxu0 }
 0x402   :  { %950 = vtanh.f32 %v636_v31 }
 0x40c   :  { %v951_v33 = vpop.eup %950 }
 0x40d   :  { %v640_v34 = vmul.f32 %v951_v33, %v1121_v38  ;;  %v648_v35 = vmul.f32 %v951_v33, %v951_v33 }
 0x40f   :  { %v649_v36 = vmul.f32 %v648_v35, %v1121_v38  ;;  %v641_v37 = vsel %vm402_vm4, %v640_v34, 0.0 }
 0x410   :  { %v642_v39 = vrot.slane %v641_v37, 4 }
 0x411   :  { %v650_v15 = vsel %vm402_vm4, %v649_v36, 0.0 }
 0x412   :  { %v651_v8 = vrot.slane %v650_v15, 4  ;;  %v643_v40 = vadd.f32 %v642_v39, %v641_v37 }
 0x414   :  { %v644_v41 = vrot.slane %v643_v40, 2  ;;  %v652_v42 = vadd.f32 %v651_v8, %v650_v15 }
 0x416   :  { %v645_v43 = vadd.f32 %v644_v41, %v643_v40  ;;  %v653_v44 = vrot.slane %v652_v42, 2 }
 0x418   :  { %v646_v45 = vrot.slane %v645_v43, 1  ;;  %v654_v46 = vadd.f32 %v653_v44, %v652_v42 }
 0x41a   :  { %v647_v47 = vadd.f32 %v646_v45, %v645_v43  ;;  %v655_v48 = vrot.slane %v654_v46, 1 }
 0x41c   :  { %v656_v49 = vadd.f32 %v655_v48, %v654_v46  ;;  %v657_v50 = vmul.f32 %v647_v47, %v647_v47 }
 0x41e   :  { %v658_v51 = vsub.f32 %v656_v49, %v657_v50 }
 0x420   :  { %v659_v52 = vadd.f32 1e-05, %v658_v51 }
 0x422   :  { %952 = vrsqrt.f32 %v659_v52 }
 0x42c   :  { %v953_v38 = vpop.eup %952 }
 0x42d   :  { %v661_v53 = vmul.f32 %v953_v38, %v1180_v60  ;;  %v772_v60 = vld [vmem:[%s1267_s13] ss:$0 sm:$0xff] }
 0x42f   :  { %v667_v55 = vmul.f32 %v661_v53, %v647_v47  ;;  %v665_v57 = vrot.slane %v661_v53, %v664_v54 }
 0x431   :  { %v669_v58 = vrot.slane %v667_v55, 7  ;;  %v666_v61 = vmul.f32 %v951_v33, %v665_v57 }
 0x433   :  { %v671_v59 = vsub.f32 %v233_v56, %v669_v58 }
 0x435   :  { %v675_v62 = vrot.slane %v671_v59, %v1141_v2 }
 0x437   :  { %v676_v0 = vadd.f32 %v675_v62, %v666_v61 }
 0x439   :  { %882 = vmatmul.mubr.msk.f32.vlgmr.msra.gmra.mrb[8].mxu0 %vm402_vm4, %v676_v0 }
 0x50c   :  { %v757_v1 = vpop.f32.mrb[8].mxu0 }
 0x50d   :  { %v758_v63 = vadd.f32 %v772_v60, %v757_v1  ;;  %v883_v4 = vpop.f32.mrb[9].mxu0 }
 0x50f   :  { %761 = vst [vmem:[%s1268_s14] sm:$0xff] %v758_v63 }

</bundles_post_ra>
